<compile_context>
chip_gen: v7x
topology: tpu7x:2x2x1
jax: 0.10.0
libtpu: 0.0.40
codegen_flags: <defaults>
</compile_context>

<pallas_src>
import jax
import jax.numpy as jnp
from jax.experimental import pallas as pl
from jax.experimental.pallas import tpu as pltpu


def _round_up(n, m):
    return ((n + m - 1) // m) * m


def rnn_kernel(xp_ref, whh_ref, wfc_ref, bfc_ref, out_ref, h_ref):
    # xp_ref : (T, Bp, Hp)  pre-projected inputs (input-proj + both biases folded in)
    # whh_ref: (Hp, Hp)     recurrent weight, transposed + zero-padded
    # wfc_ref: (Hp, Op)     fc weight, transposed + zero-padded
    # bfc_ref: (1, Op)      fc bias, zero-padded
    # out_ref: (Bp, Op)     padded output
    # h_ref  : (Bp, Hp)     VMEM scratch hidden state
    h_ref[...] = jnp.zeros_like(h_ref)
    T = xp_ref.shape[0]

    def step(t, carry):
        h = h_ref[...]
        pre = xp_ref[t] + jnp.dot(h, whh_ref[...],
                                  preferred_element_type=jnp.float32)
        h_ref[...] = jnp.tanh(pre)
        return carry

    # Unrolled so the LLO scheduler can overlap the tanh (EUP) with the next
    # MXU push; T is static and small.
    jax.lax.fori_loop(0, T, step, 0, unroll=True)

    h_last = h_ref[...]
    out_ref[...] = (jnp.dot(h_last, wfc_ref[...],
                            preferred_element_type=jnp.float32)
                    + bfc_ref[...]).astype(out_ref.dtype)


def rnn_forward(x_tokens, emb_table, w_ih, w_hh, b_ih, b_hh, w_fc, b_fc):
    """x_tokens: (B, T) int32.  Returns (B, output_size) float32."""
    B, T = x_tokens.shape
    H = w_hh.shape[0]
    O = w_fc.shape[0]

    Bp = _round_up(B, 8)     # sublane tile
    Hp = _round_up(H, 128)   # lane tile
    Op = _round_up(O, 128)   # lane-dense output

    # --- Glue (plain JAX, tiny): algebraic pre-projection of the embedding. ---
    # emb(x) @ W_ih^T == (emb_table @ W_ih^T)[x]; fold both RNN biases in too.
    table_proj = emb_table @ w_ih.T + (b_ih + b_hh)            # (V, H)
    # Gather directly in time-major order: (T, B, H).  Only the int32 token
    # matrix is transposed; no float activation transpose in HBM.
    xproj = jnp.take(table_proj, x_tokens.T, axis=0)           # (T, B, H)

    # Zero-pad to hardware tiles.  Padded rows/cols stay exactly zero through
    # the recurrence (pad inputs are 0, pad weight rows/cols are 0, tanh(0)=0).
    xp = jnp.zeros((T, Bp, Hp), jnp.float32).at[:, :B, :H].set(xproj)
    whh = jnp.zeros((Hp, Hp), jnp.float32).at[:H, :H].set(w_hh.T)
    wfc = jnp.zeros((Hp, Op), jnp.float32).at[:H, :O].set(w_fc.T)
    bfc = jnp.zeros((1, Op), jnp.float32).at[0, :O].set(b_fc)

    grid_spec = pltpu.PrefetchScalarGridSpec(
        num_scalar_prefetch=0,
        grid=(1,),                                   # single invocation; the time
        in_specs=[                                   # loop lives inside the kernel
            pl.BlockSpec((T, Bp, Hp), lambda i: (0, 0, 0)),
            pl.BlockSpec((Hp, Hp), lambda i: (0, 0)),
            pl.BlockSpec((Hp, Op), lambda i: (0, 0)),
            pl.BlockSpec((1, Op), lambda i: (0, 0)),
        ],
        out_specs=pl.BlockSpec((Bp, Op), lambda i: (0, 0)),
        scratch_shapes=[pltpu.VMEM((Bp, Hp), jnp.float32)],
    )

    out_padded = pl.pallas_call(
        rnn_kernel,
        out_shape=jax.ShapeDtypeStruct((Bp, Op), jnp.float32),
        grid_spec=grid_spec,
        compiler_params=pltpu.CompilerParams(
            dimension_semantics=("arbitrary",)),
    )(xp, whh, wfc, bfc)

    return out_padded[:B, :O]


def reference_forward(x_tokens, emb_table, w_ih, w_hh, b_ih, b_hh, w_fc, b_fc):
    """Pure-JAX reference mirroring torch semantics."""
    emb = jnp.take(emb_table, x_tokens, axis=0)        # (B, T, E)
    B = x_tokens.shape[0]
    H = w_hh.shape[0]
    h0 = jnp.zeros((B, H), jnp.float32)

    def step(h, x_t):
        h_new = jnp.tanh(x_t @ w_ih.T + b_ih + h @ w_hh.T + b_hh)
        return h_new, None

    h_last, _ = jax.lax.scan(step, h0, jnp.transpose(emb, (1, 0, 2)))
    return h_last @ w_fc.T + b_fc


if __name__ == "__main__":
    vocab_size = 20
    emb_size = 300
    hidden_size = 50
    output_size = 1
    padding_idx = 0
    B, T = 2, 8

    key = jax.random.PRNGKey(0)
    k_emb, k_ih, k_hh, k_bih, k_bhh, k_fc, k_bfc, k_x = jax.random.split(key, 8)

    # Deterministic parameter init (shapes match the nn.Module).
    emb_table = jax.random.normal(k_emb, (vocab_size, emb_size), jnp.float32) * 0.1
    emb_table = emb_table.at[padding_idx].set(0.0)     # padding_idx row is zero
    w_ih = jax.random.normal(k_ih, (hidden_size, emb_size), jnp.float32) * 0.1
    w_hh = jax.random.normal(k_hh, (hidden_size, hidden_size), jnp.float32) * 0.1
    b_ih = jax.random.normal(k_bih, (hidden_size,), jnp.float32) * 0.1
    b_hh = jax.random.normal(k_bhh, (hidden_size,), jnp.float32) * 0.1
    w_fc = jax.random.normal(k_fc, (output_size, hidden_size), jnp.float32) * 0.1
    b_fc = jax.random.normal(k_bfc, (output_size,), jnp.float32) * 0.1

    # Example input: (B, T) token ids (including some padding_idx tokens).
    x = jax.random.randint(k_x, (B, T), 0, vocab_size, dtype=jnp.int32)

    out = rnn_forward(x, emb_table, w_ih, w_hh, b_ih, b_hh, w_fc, b_fc)
    out = jax.block_until_ready(out)

    ref = reference_forward(x, emb_table, w_ih, w_hh, b_ih, b_hh, w_fc, b_fc)
    assert out.shape == (B, output_size)
    assert jnp.allclose(out, ref, atol=1e-4, rtol=1e-4)

    print("KERNEL_OK")
</pallas_src>

<mosaic_0001>
module attributes {stable_mosaic.version = 11 : i64} {
  func.func @rnn_kernel(%arg0: i32, %arg1: memref<8x8x128xf32, #tpu.memory_space<vmem>>, %arg2: memref<128x128xf32, #tpu.memory_space<vmem>>, %arg3: memref<128x128xf32, #tpu.memory_space<vmem>>, %arg4: memref<1x128xf32, #tpu.memory_space<vmem>>, %arg5: memref<8x128xf32, #tpu.memory_space<vmem>>, %arg6: memref<8x128xf32, #tpu.memory_space<vmem>>) attributes {dimension_semantics = [#tpu.dimension_semantics<arbitrary>], iteration_bounds = array<i64: 1>, scalar_prefetch = 0 : i64, scratch_operands = 1 : i64, tpu.core_type = #tpu.core_type<tc>, window_params = [{pipeline_mode = #tpu.pipeline_mode<synchronous>, transform_indices = @transform_0, window_bounds = array<i64: 8, 8, 128>}, {pipeline_mode = #tpu.pipeline_mode<synchronous>, transform_indices = @transform_1, window_bounds = array<i64: 128, 128>}, {pipeline_mode = #tpu.pipeline_mode<synchronous>, transform_indices = @transform_2, window_bounds = array<i64: 128, 128>}, {pipeline_mode = #tpu.pipeline_mode<synchronous>, transform_indices = @transform_3, window_bounds = array<i64: 1, 128>}, {pipeline_mode = #tpu.pipeline_mode<synchronous>, transform_indices = @transform_4, window_bounds = array<i64: 8, 128>}]} {
    %cst = arith.constant 0.000000e+00 : f32
    %0 = vector.broadcast %cst : f32 to vector<8x128xf32>
    %c0 = arith.constant 0 : index
    %c0_0 = arith.constant 0 : index
    %1 = vector.load %arg6[%c0, %c0_0] : memref<8x128xf32, #tpu.memory_space<vmem>>, vector<8x128xf32>
    tpu.vector_store %arg6[%c0, %c0_0], %0 {strides = array<i32>} : memref<8x128xf32, #tpu.memory_space<vmem>>, vector<8x128xf32>,
    %c0_i32 = arith.constant 0 : i32
    %c0_1 = arith.constant 0 : index
    %c0_2 = arith.constant 0 : index
    %2 = vector.load %arg6[%c0_1, %c0_2] : memref<8x128xf32, #tpu.memory_space<vmem>>, vector<8x128xf32>
    %3 = arith.index_cast %c0_i32 : i32 to index
    %c0_3 = arith.constant 0 : index
    %c0_4 = arith.constant 0 : index
    %4 = vector.load %arg1[%3, %c0_3, %c0_4] : memref<8x8x128xf32, #tpu.memory_space<vmem>>, vector<1x8x128xf32>
    %5 = vector.shape_cast %4 : vector<1x8x128xf32> to vector<8x128xf32>
    %c0_5 = arith.constant 0 : index
    %c0_6 = arith.constant 0 : index
    %6 = vector.load %arg2[%c0_5, %c0_6] : memref<128x128xf32, #tpu.memory_space<vmem>>, vector<128x128xf32>
    %cst_7 = arith.constant dense<0.000000e+00> : vector<8x128xf32>
    %7 = tpu.matmul %2, %6, %cst_7 {dimension_numbers = #tpu.dot_dimension_numbers<[1], [0], [0], [1], [0, 0, 1, 1], [], []>} : vector<8x128xf32>, vector<128x128xf32>, vector<8x128xf32> -> vector<8x128xf32>
    %8 = arith.addf %5, %7 : vector<8x128xf32>
    %9 = math.tanh %8 : vector<8x128xf32>
    %c0_8 = arith.constant 0 : index
    %c0_9 = arith.constant 0 : index
    %10 = vector.load %arg6[%c0_8, %c0_9] : memref<8x128xf32, #tpu.memory_space<vmem>>, vector<8x128xf32>
    tpu.vector_store %arg6[%c0_8, %c0_9], %9 {strides = array<i32>} : memref<8x128xf32, #tpu.memory_space<vmem>>, vector<8x128xf32>,
    %c1_i32 = arith.constant 1 : i32
    %c0_10 = arith.constant 0 : index
    %c0_11 = arith.constant 0 : index
    %11 = vector.load %arg6[%c0_10, %c0_11] : memref<8x128xf32, #tpu.memory_space<vmem>>, vector<8x128xf32>
    %12 = arith.index_cast %c1_i32 : i32 to index
    %c0_12 = arith.constant 0 : index
    %c0_13 = arith.constant 0 : index
    %13 = vector.load %arg1[%12, %c0_12, %c0_13] : memref<8x8x128xf32, #tpu.memory_space<vmem>>, vector<1x8x128xf32>
    %14 = vector.shape_cast %13 : vector<1x8x128xf32> to vector<8x128xf32>
    %c0_14 = arith.constant 0 : index
    %c0_15 = arith.constant 0 : index
    %15 = vector.load %arg2[%c0_14, %c0_15] : memref<128x128xf32, #tpu.memory_space<vmem>>, vector<128x128xf32>
    %cst_16 = arith.constant dense<0.000000e+00> : vector<8x128xf32>
    %16 = tpu.matmul %11, %15, %cst_16 {dimension_numbers = #tpu.dot_dimension_numbers<[1], [0], [0], [1], [0, 0, 1, 1], [], []>} : vector<8x128xf32>, vector<128x128xf32>, vector<8x128xf32> -> vector<8x128xf32>
    %17 = arith.addf %14, %16 : vector<8x128xf32>
    %18 = math.tanh %17 : vector<8x128xf32>
    %c0_17 = arith.constant 0 : index
    %c0_18 = arith.constant 0 : index
    %19 = vector.load %arg6[%c0_17, %c0_18] : memref<8x128xf32, #tpu.memory_space<vmem>>, vector<8x128xf32>
    tpu.vector_store %arg6[%c0_17, %c0_18], %18 {strides = array<i32>} : memref<8x128xf32, #tpu.memory_space<vmem>>, vector<8x128xf32>,
    %c2_i32 = arith.constant 2 : i32
    %c0_19 = arith.constant 0 : index
    %c0_20 = arith.constant 0 : index
    %20 = vector.load %arg6[%c0_19, %c0_20] : memref<8x128xf32, #tpu.memory_space<vmem>>, vector<8x128xf32>
    %21 = arith.index_cast %c2_i32 : i32 to index
    %c0_21 = arith.constant 0 : index
    %c0_22 = arith.constant 0 : index
    %22 = vector.load %arg1[%21, %c0_21, %c0_22] : memref<8x8x128xf32, #tpu.memory_space<vmem>>, vector<1x8x128xf32>
    %23 = vector.shape_cast %22 : vector<1x8x128xf32> to vector<8x128xf32>
    %c0_23 = arith.constant 0 : index
    %c0_24 = arith.constant 0 : index
    %24 = vector.load %arg2[%c0_23, %c0_24] : memref<128x128xf32, #tpu.memory_space<vmem>>, vector<128x128xf32>
    %cst_25 = arith.constant dense<0.000000e+00> : vector<8x128xf32>
    %25 = tpu.matmul %20, %24, %cst_25 {dimension_numbers = #tpu.dot_dimension_numbers<[1], [0], [0], [1], [0, 0, 1, 1], [], []>} : vector<8x128xf32>, vector<128x128xf32>, vector<8x128xf32> -> vector<8x128xf32>
    %26 = arith.addf %23, %25 : vector<8x128xf32>
    %27 = math.tanh %26 : vector<8x128xf32>
    %c0_26 = arith.constant 0 : index
    %c0_27 = arith.constant 0 : index
    %28 = vector.load %arg6[%c0_26, %c0_27] : memref<8x128xf32, #tpu.memory_space<vmem>>, vector<8x128xf32>
    tpu.vector_store %arg6[%c0_26, %c0_27], %27 {strides = array<i32>} : memref<8x128xf32, #tpu.memory_space<vmem>>, vector<8x128xf32>,
    %c3_i32 = arith.constant 3 : i32
    %c0_28 = arith.constant 0 : index
    %c0_29 = arith.constant 0 : index
    %29 = vector.load %arg6[%c0_28, %c0_29] : memref<8x128xf32, #tpu.memory_space<vmem>>, vector<8x128xf32>
    %30 = arith.index_cast %c3_i32 : i32 to index
    %c0_30 = arith.constant 0 : index
    %c0_31 = arith.constant 0 : index
    %31 = vector.load %arg1[%30, %c0_30, %c0_31] : memref<8x8x128xf32, #tpu.memory_space<vmem>>, vector<1x8x128xf32>
    %32 = vector.shape_cast %31 : vector<1x8x128xf32> to vector<8x128xf32>
    %c0_32 = arith.constant 0 : index
    %c0_33 = arith.constant 0 : index
    %33 = vector.load %arg2[%c0_32, %c0_33] : memref<128x128xf32, #tpu.memory_space<vmem>>, vector<128x128xf32>
    %cst_34 = arith.constant dense<0.000000e+00> : vector<8x128xf32>
    %34 = tpu.matmul %29, %33, %cst_34 {dimension_numbers = #tpu.dot_dimension_numbers<[1], [0], [0], [1], [0, 0, 1, 1], [], []>} : vector<8x128xf32>, vector<128x128xf32>, vector<8x128xf32> -> vector<8x128xf32>
    %35 = arith.addf %32, %34 : vector<8x128xf32>
    %36 = math.tanh %35 : vector<8x128xf32>
    %c0_35 = arith.constant 0 : index
    %c0_36 = arith.constant 0 : index
    %37 = vector.load %arg6[%c0_35, %c0_36] : memref<8x128xf32, #tpu.memory_space<vmem>>, vector<8x128xf32>
    tpu.vector_store %arg6[%c0_35, %c0_36], %36 {strides = array<i32>} : memref<8x128xf32, #tpu.memory_space<vmem>>, vector<8x128xf32>,
    %c4_i32 = arith.constant 4 : i32
    %c0_37 = arith.constant 0 : index
    %c0_38 = arith.constant 0 : index
    %38 = vector.load %arg6[%c0_37, %c0_38] : memref<8x128xf32, #tpu.memory_space<vmem>>, vector<8x128xf32>
    %39 = arith.index_cast %c4_i32 : i32 to index
    %c0_39 = arith.constant 0 : index
    %c0_40 = arith.constant 0 : index
    %40 = vector.load %arg1[%39, %c0_39, %c0_40] : memref<8x8x128xf32, #tpu.memory_space<vmem>>, vector<1x8x128xf32>
    %41 = vector.shape_cast %40 : vector<1x8x128xf32> to vector<8x128xf32>
    %c0_41 = arith.constant 0 : index
    %c0_42 = arith.constant 0 : index
    %42 = vector.load %arg2[%c0_41, %c0_42] : memref<128x128xf32, #tpu.memory_space<vmem>>, vector<128x128xf32>
    %cst_43 = arith.constant dense<0.000000e+00> : vector<8x128xf32>
    %43 = tpu.matmul %38, %42, %cst_43 {dimension_numbers = #tpu.dot_dimension_numbers<[1], [0], [0], [1], [0, 0, 1, 1], [], []>} : vector<8x128xf32>, vector<128x128xf32>, vector<8x128xf32> -> vector<8x128xf32>
    %44 = arith.addf %41, %43 : vector<8x128xf32>
    %45 = math.tanh %44 : vector<8x128xf32>
    %c0_44 = arith.constant 0 : index
    %c0_45 = arith.constant 0 : index
    %46 = vector.load %arg6[%c0_44, %c0_45] : memref<8x128xf32, #tpu.memory_space<vmem>>, vector<8x128xf32>
    tpu.vector_store %arg6[%c0_44, %c0_45], %45 {strides = array<i32>} : memref<8x128xf32, #tpu.memory_space<vmem>>, vector<8x128xf32>,
    %c5_i32 = arith.constant 5 : i32
    %c0_46 = arith.constant 0 : index
    %c0_47 = arith.constant 0 : index
    %47 = vector.load %arg6[%c0_46, %c0_47] : memref<8x128xf32, #tpu.memory_space<vmem>>, vector<8x128xf32>
    %48 = arith.index_cast %c5_i32 : i32 to index
    %c0_48 = arith.constant 0 : index
    %c0_49 = arith.constant 0 : index
    %49 = vector.load %arg1[%48, %c0_48, %c0_49] : memref<8x8x128xf32, #tpu.memory_space<vmem>>, vector<1x8x128xf32>
    %50 = vector.shape_cast %49 : vector<1x8x128xf32> to vector<8x128xf32>
    %c0_50 = arith.constant 0 : index
    %c0_51 = arith.constant 0 : index
    %51 = vector.load %arg2[%c0_50, %c0_51] : memref<128x128xf32, #tpu.memory_space<vmem>>, vector<128x128xf32>
    %cst_52 = arith.constant dense<0.000000e+00> : vector<8x128xf32>
    %52 = tpu.matmul %47, %51, %cst_52 {dimension_numbers = #tpu.dot_dimension_numbers<[1], [0], [0], [1], [0, 0, 1, 1], [], []>} : vector<8x128xf32>, vector<128x128xf32>, vector<8x128xf32> -> vector<8x128xf32>
    %53 = arith.addf %50, %52 : vector<8x128xf32>
    %54 = math.tanh %53 : vector<8x128xf32>
    %c0_53 = arith.constant 0 : index
    %c0_54 = arith.constant 0 : index
    %55 = vector.load %arg6[%c0_53, %c0_54] : memref<8x128xf32, #tpu.memory_space<vmem>>, vector<8x128xf32>
    tpu.vector_store %arg6[%c0_53, %c0_54], %54 {strides = array<i32>} : memref<8x128xf32, #tpu.memory_space<vmem>>, vector<8x128xf32>,
    %c6_i32 = arith.constant 6 : i32
    %c0_55 = arith.constant 0 : index
    %c0_56 = arith.constant 0 : index
    %56 = vector.load %arg6[%c0_55, %c0_56] : memref<8x128xf32, #tpu.memory_space<vmem>>, vector<8x128xf32>
    %57 = arith.index_cast %c6_i32 : i32 to index
    %c0_57 = arith.constant 0 : index
    %c0_58 = arith.constant 0 : index
    %58 = vector.load %arg1[%57, %c0_57, %c0_58] : memref<8x8x128xf32, #tpu.memory_space<vmem>>, vector<1x8x128xf32>
    %59 = vector.shape_cast %58 : vector<1x8x128xf32> to vector<8x128xf32>
    %c0_59 = arith.constant 0 : index
    %c0_60 = arith.constant 0 : index
    %60 = vector.load %arg2[%c0_59, %c0_60] : memref<128x128xf32, #tpu.memory_space<vmem>>, vector<128x128xf32>
    %cst_61 = arith.constant dense<0.000000e+00> : vector<8x128xf32>
    %61 = tpu.matmul %56, %60, %cst_61 {dimension_numbers = #tpu.dot_dimension_numbers<[1], [0], [0], [1], [0, 0, 1, 1], [], []>} : vector<8x128xf32>, vector<128x128xf32>, vector<8x128xf32> -> vector<8x128xf32>
    %62 = arith.addf %59, %61 : vector<8x128xf32>
    %63 = math.tanh %62 : vector<8x128xf32>
    %c0_62 = arith.constant 0 : index
    %c0_63 = arith.constant 0 : index
    %64 = vector.load %arg6[%c0_62, %c0_63] : memref<8x128xf32, #tpu.memory_space<vmem>>, vector<8x128xf32>
    tpu.vector_store %arg6[%c0_62, %c0_63], %63 {strides = array<i32>} : memref<8x128xf32, #tpu.memory_space<vmem>>, vector<8x128xf32>,
    %c7_i32 = arith.constant 7 : i32
    %c0_64 = arith.constant 0 : index
    %c0_65 = arith.constant 0 : index
    %65 = vector.load %arg6[%c0_64, %c0_65] : memref<8x128xf32, #tpu.memory_space<vmem>>, vector<8x128xf32>
    %66 = arith.index_cast %c7_i32 : i32 to index
    %c0_66 = arith.constant 0 : index
    %c0_67 = arith.constant 0 : index
    %67 = vector.load %arg1[%66, %c0_66, %c0_67] : memref<8x8x128xf32, #tpu.memory_space<vmem>>, vector<1x8x128xf32>
    %68 = vector.shape_cast %67 : vector<1x8x128xf32> to vector<8x128xf32>
    %c0_68 = arith.constant 0 : index
    %c0_69 = arith.constant 0 : index
    %69 = vector.load %arg2[%c0_68, %c0_69] : memref<128x128xf32, #tpu.memory_space<vmem>>, vector<128x128xf32>
    %cst_70 = arith.constant dense<0.000000e+00> : vector<8x128xf32>
    %70 = tpu.matmul %65, %69, %cst_70 {dimension_numbers = #tpu.dot_dimension_numbers<[1], [0], [0], [1], [0, 0, 1, 1], [], []>} : vector<8x128xf32>, vector<128x128xf32>, vector<8x128xf32> -> vector<8x128xf32>
    %71 = arith.addf %68, %70 : vector<8x128xf32>
    %72 = math.tanh %71 : vector<8x128xf32>
    %c0_71 = arith.constant 0 : index
    %c0_72 = arith.constant 0 : index
    %73 = vector.load %arg6[%c0_71, %c0_72] : memref<8x128xf32, #tpu.memory_space<vmem>>, vector<8x128xf32>
    tpu.vector_store %arg6[%c0_71, %c0_72], %72 {strides = array<i32>} : memref<8x128xf32, #tpu.memory_space<vmem>>, vector<8x128xf32>,
    %c8_i32 = arith.constant 8 : i32
    %c0_73 = arith.constant 0 : index
    %c0_74 = arith.constant 0 : index
    %74 = vector.load %arg6[%c0_73, %c0_74] : memref<8x128xf32, #tpu.memory_space<vmem>>, vector<8x128xf32>
    %c0_75 = arith.constant 0 : index
    %c0_76 = arith.constant 0 : index
    %75 = vector.load %arg3[%c0_75, %c0_76] : memref<128x128xf32, #tpu.memory_space<vmem>>, vector<128x128xf32>
    %cst_77 = arith.constant dense<0.000000e+00> : vector<8x128xf32>
    %76 = tpu.matmul %74, %75, %cst_77 {dimension_numbers = #tpu.dot_dimension_numbers<[1], [0], [0], [1], [0, 0, 1, 1], [], []>} : vector<8x128xf32>, vector<128x128xf32>, vector<8x128xf32> -> vector<8x128xf32>
    %c0_78 = arith.constant 0 : index
    %c0_79 = arith.constant 0 : index
    %77 = vector.load %arg4[%c0_78, %c0_79] : memref<1x128xf32, #tpu.memory_space<vmem>>, vector<1x128xf32>
    %78 = vector.broadcast %77 : vector<1x128xf32> to vector<8x128xf32>
    %79 = arith.addf %76, %78 : vector<8x128xf32>
    %c0_80 = arith.constant 0 : index
    %c0_81 = arith.constant 0 : index
    %80 = vector.load %arg5[%c0_80, %c0_81] : memref<8x128xf32, #tpu.memory_space<vmem>>, vector<8x128xf32>
    tpu.vector_store %arg5[%c0_80, %c0_81], %79 {strides = array<i32>} : memref<8x128xf32, #tpu.memory_space<vmem>>, vector<8x128xf32>,
    return
  }
  func.func @transform_0(%arg0: i32) -> (i32, i32, i32) {
    %c0_i32 = arith.constant 0 : i32
    %c0_i32_0 = arith.constant 0 : i32
    %c0_i32_1 = arith.constant 0 : i32
    %c0_i32_2 = arith.constant 0 : i32
    return %c0_i32, %c0_i32_0, %c0_i32_1 : i32, i32, i32
  }
  func.func @transform_1(%arg0: i32) -> (i32, i32) {
    %c0_i32 = arith.constant 0 : i32
    %c0_i32_0 = arith.constant 0 : i32
    %c0_i32_1 = arith.constant 0 : i32
    return %c0_i32, %c0_i32_0 : i32, i32
  }
  func.func @transform_2(%arg0: i32) -> (i32, i32) {
    %c0_i32 = arith.constant 0 : i32
    %c0_i32_0 = arith.constant 0 : i32
    %c0_i32_1 = arith.constant 0 : i32
    return %c0_i32, %c0_i32_0 : i32, i32
  }
  func.func @transform_3(%arg0: i32) -> (i32, i32) {
    %c0_i32 = arith.constant 0 : i32
    %c0_i32_0 = arith.constant 0 : i32
    %c0_i32_1 = arith.constant 0 : i32
    return %c0_i32, %c0_i32_0 : i32, i32
  }
  func.func @transform_4(%arg0: i32) -> (i32, i32) {
    %c0_i32 = arith.constant 0 : i32
    %c0_i32_0 = arith.constant 0 : i32
    %c0_i32_1 = arith.constant 0 : i32
    return %c0_i32, %c0_i32_0 : i32, i32
  }
}

</mosaic_0001>

<bundles_post_ra>
// kernel: tpu_custom_call.1
= control target key start
LH: loop header
LB: loop body
LE: loop exit
PB: predicated region body
PF: predicated region fallthrough
CT: control target
= control target key end

     0   :  { %9 = vsyncpa [#allocation4], 0  ;;  %s1982_s0 = inlined_call_operand.hbm [shape: f32[8,8,128], index: 0, kind: input, shape index: {}]   ;;  %s1983_s1 = inlined_call_operand.hbm [shape: f32[128,128], index: 1, kind: input, shape index: {}]   ;;  %s1984_s2 = inlined_call_operand.hbm [shape: f32[128,128], index: 2, kind: input, shape index: {}]   ;;  %s1985_s3 = inlined_call_operand.vmem [shape: f32[1,128], index: 3, kind: input, shape index: {}]   ;;  %s1986_s4 = inlined_call_operand.hbm [shape: f32[8,128], index: 4, kind: output, shape index: {}]  }
   0x1   :  { %10 = vsyncpa [#allocation7], 0 }
   0x2   :  { %11 = vsyncpa [#allocation5], 0  ;;  %s1710_s15 = smov [#allocation6]   ;;  %s1711_s17 = smov [#allocation3]  }
   0x3   :  { %s29_s16 = sshll.u32 %s1710_s15, 4  ;;  %s17_s18 = sshll.u32 %s1711_s17, 4  ;;  %s30_s16 = int_to_ptr.vmem [resolvable:$true] %s29_s16  ;;  %s1744_s18 = int_to_ptr.vmem [resolvable:$true] %s17_s18 }
   0x4   :  { %s1616_s21 = scalar_lea.hbm %s1983_s1, 2048 }
   0x5   :  { %p1617_p0 = scmp.ne.s32.totalorder %s1983_s1, %s1616_s21  ;;  %p1620_p1 = scmp.lt.u32.totalorder %s1616_s21, %s1983_s1 }
   0x7   :  { %p1622_p2 = pnand %p1620_p1, %p1617_p0 }
   0x9   :  { %1625 = shalt.err (!%p1622_p2)
}
   0xa   :  { %s1626_s26 = scalar_lea.vmem %s30_s16, 2048  ;;  %p1631_p4 = scmp.lt.s32.totalorder %s30_s16, %s30_s16 }
   0xb   :  { %p1627_p3 = scmp.ne.s32.totalorder %s30_s16, %s1626_s26  ;;  %p1632_p5 = scmp.lt.s32.totalorder %s1626_s26, %s1626_s26 }
   0xd   :  { %p1633_p6 = por %p1632_p5, %p1631_p4 }
   0xf   :  { %p1634_p7 = pnand %p1633_p6, %p1627_p3 }
  0x11   :  { %1637 = shalt.err (!%p1634_p7)
}
  0x12   :  { %s1712_s27 = smov 128   ;;  %s1713_s28 = smov 8  }
  0x13   :  { %35 = dma.hbm_to_vmem [thread:$0]  %s1983_s1, 2048, %s30_s16, [#allocation7], %s1712_s27, %s1712_s27, %s1713_s28  }
  0x14   :  { %s1638_s7 = scalar_lea.hbm %s1982_s0, 1024 }
  0x15   :  { %p1639_p8 = scmp.ne.s32.totalorder %s1982_s0, %s1638_s7  ;;  %p1642_p9 = scmp.lt.u32.totalorder %s1638_s7, %s1982_s0 }
  0x17   :  { %p1644_p10 = pnand %p1642_p9, %p1639_p8 }
  0x19   :  { %1647 = shalt.err (!%p1644_p10)
}
  0x1a   :  { %s1648_s12 = scalar_lea.vmem %s1744_s18, 1024  ;;  %p1653_p12 = scmp.lt.s32.totalorder %s1744_s18, %s1744_s18 }
  0x1b   :  { %p1649_p11 = scmp.ne.s32.totalorder %s1744_s18, %s1648_s12  ;;  %p1654_p13 = scmp.lt.s32.totalorder %s1648_s12, %s1648_s12 }
  0x1d   :  { %p1655_p0 = por %p1654_p13, %p1653_p12 }
  0x1f   :  { %p1656_p1 = pnand %p1655_p0, %p1649_p11 }
  0x21   :  { %1659 = shalt.err (!%p1656_p1)
}
  0x22   :  { %23 = dma.hbm_to_vmem [thread:$0]  %s1982_s0, 1024, %s1744_s18, [#allocation4], %s1712_s27, %s1712_s27, %s1713_s28  }
  0x23   :  { %s1714_s14 = smov [#allocation8]   ;;  %s1660_s19 = scalar_lea.hbm %s1984_s2, 2048 }
  0x24   :  { %s41_s15 = sshll.u32 %s1714_s14, 4  ;;  %p1661_p2 = scmp.ne.s32.totalorder %s1984_s2, %s1660_s19  ;;  %s42_s15 = int_to_ptr.vmem [resolvable:$true] %s41_s15 }
  0x25   :  { %p1664_p3 = scmp.lt.u32.totalorder %s1660_s19, %s1984_s2 }
  0x27   :  { %p1666_p4 = pnand %p1664_p3, %p1661_p2 }
  0x29   :  { %1669 = shalt.err (!%p1666_p4)
}
  0x2a   :  { %s1670_s24 = scalar_lea.vmem %s42_s15, 2048  ;;  %p1675_p6 = scmp.lt.s32.totalorder %s42_s15, %s42_s15 }
  0x2b   :  { %p1671_p5 = scmp.ne.s32.totalorder %s42_s15, %s1670_s24  ;;  %p1676_p7 = scmp.lt.s32.totalorder %s1670_s24, %s1670_s24 }
  0x2d   :  { %p1677_p8 = por %p1676_p7, %p1675_p6 }
  0x2f   :  { %p1678_p9 = pnand %p1677_p8, %p1671_p5 }
  0x31   :  { %1681 = shalt.err (!%p1678_p9)
}
  0x32   :  { %47 = dma.hbm_to_vmem [thread:$0]  %s1984_s2, 2048, %s42_s15, [#allocation7], %s1712_s27, %s1712_s27, %s1713_s28  }
  0x33   :  { %1704 = dma.done.wait [#allocation4], 1024  }
  0x34   :  { %1705 = vsyncadd [#allocation4], 4294966272 }
  0x35   :  { %1706 = dma.done.wait [#allocation7], 4096  }
  0x36   :  { %1707 = vsyncadd [#allocation7], 4294963200  ;;  %v1715_v0 = vmov 0.0|0.0   ;;  %vm1716_vm0 = vmmov 0   ;;  %v1717_v1 = vmov 0.0   ;;  %v62_v2 = vld [vmem:[#allocation6] sm:$0xff] }
  0x37   :  { %1375 = vmatprep.subr.bf16.mxu0 %v1715_v0  ;;  %1092 = vmatprep.mubr.msk.f32.mxu0 %vm1716_vm0, %v1717_v1  ;;  %v63_v3 = vld [vmem:[#allocation6 + $0x8] sm:$0xff]  ;;  %v64_v4 = vld [vmem:[#allocation6 + $0x10] sm:$0xff]  ;;  %v65_v6 = vld [vmem:[#allocation6 + $0x18] sm:$0xff]  ;;  %s1718_s26 = smov [#allocation9]  }
  0x38   :  { %1399 = vmatprep.subr.bf16.mxu1 %v1715_v0  ;;  %1127 = vmatprep.mubr.msk.f32.mxu1 %vm1716_vm0, %v1717_v1  ;;  %v1802_v5 = vpack.c.bf16 %v63_v3, %v62_v2  ;;  %v1805_v7 = vpack.c.bf16 %v65_v6, %v64_v4  ;;  %v66_v8 = vld [vmem:[#allocation6 + $0x20] sm:$0xff]  ;;  %v67_v9 = vld [vmem:[#allocation6 + $0x28] sm:$0xff]  ;;  %v68_v11 = vld [vmem:[#allocation6 + $0x30] sm:$0xff]  ;;  %s896_s27 = sshll.u32 %s1718_s26, 4  ;;  %s897_s27 = int_to_ptr.vmem [resolvable:$true] %s896_s27 }
  0x39   :  { %v1811_v10 = vpack.c.bf16 %v67_v9, %v66_v8  ;;  %v69_v12 = vld [vmem:[#allocation6 + $0x38] sm:$0xff]  ;;  %v70_v14 = vld [vmem:[#allocation6 + $0x40] sm:$0xff]  ;;  %v71_v15 = vld [vmem:[#allocation6 + $0x48] sm:$0xff]  ;;  %s1682_s28 = scalar_lea.vmem %s897_s27, 128  ;;  %p1687_p11 = scmp.lt.s32.totalorder %s897_s27, %s897_s27 }
  0x3a   :  { %1377 = vmatpush3.bf16.msra.mxu0 %v1802_v5  ;;  %1401 = vmatpush3.bf16.msra.mxu1 %v1802_v5  ;;  %v1817_v13 = vpack.c.bf16 %v69_v12, %v68_v11  ;;  %v1823_v16 = vpack.c.bf16 %v71_v15, %v70_v14  ;;  %v72_v17 = vld [vmem:[#allocation6 + $0x50] sm:$0xff]  ;;  %v73_v18 = vld [vmem:[#allocation6 + $0x58] sm:$0xff]  ;;  %v74_v20 = vld [vmem:[#allocation6 + $0x60] sm:$0xff]  ;;  %p1683_p10 = scmp.ne.s32.totalorder %s897_s27, %s1682_s28  ;;  %p1688_p12 = scmp.lt.s32.totalorder %s1682_s28, %s1682_s28 }
  0x3b   :  { %1378 = vmatprep.subr.bf16.mxu0 %v1715_v0  ;;  %1402 = vmatprep.subr.bf16.mxu1 %v1715_v0  ;;  %v1829_v19 = vpack.c.bf16 %v73_v18, %v72_v17  ;;  %v75_v21 = vld [vmem:[#allocation6 + $0x68] sm:$0xff]  ;;  %v76_v23 = vld [vmem:[#allocation6 + $0x70] sm:$0xff]  ;;  %v77_v24 = vld [vmem:[#allocation6 + $0x78] sm:$0xff] }
  0x3c   :  { %v1835_v22 = vpack.c.bf16 %v75_v21, %v74_v20  ;;  %v1841_v25 = vpack.c.bf16 %v77_v24, %v76_v23  ;;  %v61_v26 = vld [vmem:[#allocation3] sm:$0xff]  ;;  %v153_v31 = vld [vmem:[#allocation3 + $0x8] sm:$0xff]  ;;  %v245_v36 = vld [vmem:[#allocation3 + $0x10] sm:$0xff]  ;;  %p1689_p13 = por %p1688_p12, %p1687_p11 }
  0x3d   :  { %v337_v41 = vld [vmem:[#allocation3 + $0x18] sm:$0xff]  ;;  %v429_v46 = vld [vmem:[#allocation3 + $0x20] sm:$0xff]  ;;  %v521_v51 = vld [vmem:[#allocation3 + $0x28] sm:$0xff] }
  0x3e   :  { %1380 = vmatpush3.bf16.msra.mxu0 %v1805_v7  ;;  %1404 = vmatpush3.bf16.msra.mxu1 %v1805_v7  ;;  %v796_v56 = vld [vmem:[#allocation8] sm:$0xff]  ;;  %v797_v57 = vld [vmem:[#allocation8 + $0x8] sm:$0xff]  ;;  %v798_v58 = vld [vmem:[#allocation8 + $0x10] sm:$0xff]  ;;  %p1690_p0 = pnand %p1689_p13, %p1683_p10 }
  0x3f   :  { %1381 = vmatprep.subr.bf16.mxu0 %v1715_v0  ;;  %1405 = vmatprep.subr.bf16.mxu1 %v1715_v0  ;;  %v1568_v59 = vpack.c.bf16 %v797_v57, %v796_v56  ;;  %v799_v60 = vld [vmem:[#allocation8 + $0x18] sm:$0xff]  ;;  %v800_v62 = vld [vmem:[#allocation8 + $0x20] sm:$0xff]  ;;  %v801_v63 = vld [vmem:[#allocation8 + $0x28] sm:$0xff] }
  0x40   :  { %v1571_v61 = vpack.c.bf16 %v799_v60, %v798_v58  ;;  %v1574_v2 = vpack.c.bf16 %v801_v63, %v800_v62  ;;  %v802_v3 = vld [vmem:[#allocation8 + $0x30] sm:$0xff]  ;;  %v803_v4 = vld [vmem:[#allocation8 + $0x38] sm:$0xff]  ;;  %v805_v6 = vld [vmem:[#allocation8 + $0x48] sm:$0xff] }
  0x41   :  { %v613_v8 = vld [vmem:[#allocation3 + $0x30] sm:$0xff]  ;;  %v807_v14 = vld [vmem:[#allocation8 + $0x58] sm:$0xff]  ;;  %v809_v17 = vld [vmem:[#allocation8 + $0x68] sm:$0xff] }
  0x42   :  { %1383 = vmatpush3.bf16.msra.mxu0 %v1811_v10  ;;  %1407 = vmatpush3.bf16.msra.mxu1 %v1811_v10  ;;  %v811_v20 = vld [vmem:[#allocation8 + $0x78] sm:$0xff] }
  0x43   :  { %1384 = vmatprep.subr.bf16.mxu0 %v1715_v0  ;;  %1408 = vmatprep.subr.bf16.mxu1 %v1715_v0 }
  0x46   :  { %1386 = vmatpush3.bf16.msra.mxu0 %v1817_v13  ;;  %1410 = vmatpush3.bf16.msra.mxu1 %v1817_v13 }
  0x47   :  { %1387 = vmatprep.subr.bf16.mxu0 %v1715_v0  ;;  %1411 = vmatprep.subr.bf16.mxu1 %v1715_v0 }
  0x4a   :  { %1389 = vmatpush3.bf16.msra.mxu0 %v1823_v16  ;;  %1413 = vmatpush3.bf16.msra.mxu1 %v1823_v16 }
  0x4b   :  { %1390 = vmatprep.subr.bf16.mxu0 %v1715_v0  ;;  %1414 = vmatprep.subr.bf16.mxu1 %v1715_v0 }
  0x4e   :  { %1392 = vmatpush3.bf16.msra.mxu0 %v1829_v19  ;;  %1416 = vmatpush3.bf16.msra.mxu1 %v1829_v19 }
  0x4f   :  { %1393 = vmatprep.subr.bf16.mxu0 %v1715_v0  ;;  %1417 = vmatprep.subr.bf16.mxu1 %v1715_v0 }
  0x52   :  { %1395 = vmatpush3.bf16.msra.mxu0 %v1835_v22  ;;  %1419 = vmatpush3.bf16.msra.mxu1 %v1835_v22 }
  0x53   :  { %1396 = vmatprep.subr.bf16.mxu0 %v1715_v0  ;;  %1420 = vmatprep.subr.bf16.mxu1 %v1715_v0 }
  0x56   :  { %1398 = vmatpush3.bf16.msra.mxu0 %v1841_v25  ;;  %1422 = vmatpush3.bf16.msra.mxu1 %v1841_v25 }
  0x57   :  { %1423 = vmatprep.subr.bf16.mxu0 %v1715_v0  ;;  %1447 = vmatprep.subr.bf16.mxu1 %v1715_v0 }
  0x59   :  { %1093 = vmatmul.mubr.f32.vlgmr.msra.gmra.mrb[0].mxu0 %v1717_v1 }
  0x5a   :  { %1425 = vmatpush3.bf16.msra.mxu0 %v1802_v5  ;;  %1162 = vmatprep.mubr.msk.f32.mxu0 %vm1716_vm0, %v1717_v1 }
  0x5b   :  { %1426 = vmatprep.subr.bf16.mxu0 %v1715_v0 }
  0x5e   :  { %1428 = vmatpush3.bf16.msra.mxu0 %v1805_v7 }
  0x5f   :  { %1429 = vmatprep.subr.bf16.mxu0 %v1715_v0 }
  0x62   :  { %1431 = vmatpush3.bf16.msra.mxu0 %v1811_v10 }
  0x63   :  { %1432 = vmatprep.subr.bf16.mxu0 %v1715_v0 }
  0x66   :  { %1434 = vmatpush3.bf16.msra.mxu0 %v1817_v13 }
  0x67   :  { %1435 = vmatprep.subr.bf16.mxu0 %v1715_v0 }
  0x6a   :  { %1437 = vmatpush3.bf16.msra.mxu0 %v1823_v16 }
  0x6b   :  { %1438 = vmatprep.subr.bf16.mxu0 %v1715_v0 }
  0x6e   :  { %1440 = vmatpush3.bf16.msra.mxu0 %v1829_v19 }
  0x6f   :  { %1441 = vmatprep.subr.bf16.mxu0 %v1715_v0 }
  0x72   :  { %1443 = vmatpush3.bf16.msra.mxu0 %v1835_v22 }
  0x73   :  { %1444 = vmatprep.subr.bf16.mxu0 %v1715_v0 }
  0x76   :  { %1446 = vmatpush3.bf16.msra.mxu0 %v1841_v25 }
  0x77   :  { %1471 = vmatprep.subr.bf16.mxu0 %v1715_v0 }
 0x12c   :  { %v144_v27 = vpop.f32.mrb[0].mxu0 }
 0x12d   :  { %v148_v28 = vadd.f32 %v144_v27, %v61_v26  ;;  %v1094_v29 = vpop.f32.mrb[1].mxu0  ;;  %v906_v27 = vld [vmem:[%s1985_s3] ss:$0 sm:$0xff] }
 0x12f   :  { %1600 = vtanh.f32 %v148_v28 }
 0x139   :  { %v1601_v30 = vpop.eup %1600 }
 0x13a   :  { %1128 = vmatmul.mubr.f32.vlgmr.msra.gmra.mrb[0].mxu1 %v1601_v30 }
 0x13b   :  { %1449 = vmatpush3.bf16.msra.mxu1 %v1802_v5  ;;  %1197 = vmatprep.mubr.msk.f32.mxu1 %vm1716_vm0, %v1717_v1 }
 0x13c   :  { %1450 = vmatprep.subr.bf16.mxu1 %v1715_v0 }
 0x13f   :  { %1452 = vmatpush3.bf16.msra.mxu1 %v1805_v7 }
 0x140   :  { %1453 = vmatprep.subr.bf16.mxu1 %v1715_v0 }
 0x143   :  { %1455 = vmatpush3.bf16.msra.mxu1 %v1811_v10 }
 0x144   :  { %1456 = vmatprep.subr.bf16.mxu1 %v1715_v0 }
 0x147   :  { %1458 = vmatpush3.bf16.msra.mxu1 %v1817_v13 }
 0x148   :  { %1459 = vmatprep.subr.bf16.mxu1 %v1715_v0 }
 0x14b   :  { %1461 = vmatpush3.bf16.msra.mxu1 %v1823_v16 }
 0x14c   :  { %1462 = vmatprep.subr.bf16.mxu1 %v1715_v0 }
 0x14f   :  { %1464 = vmatpush3.bf16.msra.mxu1 %v1829_v19 }
 0x150   :  { %1465 = vmatprep.subr.bf16.mxu1 %v1715_v0 }
 0x153   :  { %1467 = vmatpush3.bf16.msra.mxu1 %v1835_v22 }
 0x154   :  { %1468 = vmatprep.subr.bf16.mxu1 %v1715_v0 }
 0x157   :  { %1470 = vmatpush3.bf16.msra.mxu1 %v1841_v25 }
 0x158   :  { %1495 = vmatprep.subr.bf16.mxu1 %v1715_v0 }
 0x20d   :  { %v236_v32 = vpop.f32.mrb[0].mxu1 }
 0x20e   :  { %v240_v33 = vadd.f32 %v236_v32, %v153_v31  ;;  %v1129_v34 = vpop.f32.mrb[1].mxu1 }
 0x210   :  { %1602 = vtanh.f32 %v240_v33 }
 0x21a   :  { %v1603_v35 = vpop.eup %1602 }
 0x21b   :  { %1163 = vmatmul.mubr.f32.vlgmr.msra.gmra.mrb[2].mxu0 %v1603_v35 }
 0x21c   :  { %1473 = vmatpush3.bf16.msra.mxu0 %v1802_v5  ;;  %1232 = vmatprep.mubr.msk.f32.mxu0 %vm1716_vm0, %v1717_v1 }
 0x21d   :  { %1474 = vmatprep.subr.bf16.mxu0 %v1715_v0 }
 0x220   :  { %1476 = vmatpush3.bf16.msra.mxu0 %v1805_v7 }
 0x221   :  { %1477 = vmatprep.subr.bf16.mxu0 %v1715_v0 }
 0x224   :  { %1479 = vmatpush3.bf16.msra.mxu0 %v1811_v10 }
 0x225   :  { %1480 = vmatprep.subr.bf16.mxu0 %v1715_v0 }
 0x228   :  { %1482 = vmatpush3.bf16.msra.mxu0 %v1817_v13 }
 0x229   :  { %1483 = vmatprep.subr.bf16.mxu0 %v1715_v0 }
 0x22c   :  { %1485 = vmatpush3.bf16.msra.mxu0 %v1823_v16 }
 0x22d   :  { %1486 = vmatprep.subr.bf16.mxu0 %v1715_v0 }
 0x230   :  { %1488 = vmatpush3.bf16.msra.mxu0 %v1829_v19 }
 0x231   :  { %1489 = vmatprep.subr.bf16.mxu0 %v1715_v0 }
 0x234   :  { %1491 = vmatpush3.bf16.msra.mxu0 %v1835_v22 }
 0x235   :  { %1492 = vmatprep.subr.bf16.mxu0 %v1715_v0 }
 0x238   :  { %1494 = vmatpush3.bf16.msra.mxu0 %v1841_v25 }
 0x239   :  { %1519 = vmatprep.subr.bf16.mxu0 %v1715_v0 }
 0x2ee   :  { %v328_v37 = vpop.f32.mrb[2].mxu0 }
 0x2ef   :  { %v332_v38 = vadd.f32 %v328_v37, %v245_v36  ;;  %v1164_v39 = vpop.f32.mrb[3].mxu0 }
 0x2f1   :  { %1604 = vtanh.f32 %v332_v38 }
 0x2fb   :  { %v1605_v40 = vpop.eup %1604 }
 0x2fc   :  { %1198 = vmatmul.mubr.f32.vlgmr.msra.gmra.mrb[2].mxu1 %v1605_v40 }
 0x2fd   :  { %1497 = vmatpush3.bf16.msra.mxu1 %v1802_v5  ;;  %1267 = vmatprep.mubr.msk.f32.mxu1 %vm1716_vm0, %v1717_v1 }
 0x2fe   :  { %1498 = vmatprep.subr.bf16.mxu1 %v1715_v0 }
 0x301   :  { %1500 = vmatpush3.bf16.msra.mxu1 %v1805_v7 }
 0x302   :  { %1501 = vmatprep.subr.bf16.mxu1 %v1715_v0 }
 0x305   :  { %1503 = vmatpush3.bf16.msra.mxu1 %v1811_v10 }
 0x306   :  { %1504 = vmatprep.subr.bf16.mxu1 %v1715_v0 }
 0x309   :  { %1506 = vmatpush3.bf16.msra.mxu1 %v1817_v13 }
 0x30a   :  { %1507 = vmatprep.subr.bf16.mxu1 %v1715_v0 }
 0x30d   :  { %1509 = vmatpush3.bf16.msra.mxu1 %v1823_v16 }
 0x30e   :  { %1510 = vmatprep.subr.bf16.mxu1 %v1715_v0 }
 0x311   :  { %1512 = vmatpush3.bf16.msra.mxu1 %v1829_v19 }
 0x312   :  { %1513 = vmatprep.subr.bf16.mxu1 %v1715_v0 }
 0x315   :  { %1515 = vmatpush3.bf16.msra.mxu1 %v1835_v22 }
 0x316   :  { %1516 = vmatprep.subr.bf16.mxu1 %v1715_v0 }
 0x319   :  { %1518 = vmatpush3.bf16.msra.mxu1 %v1841_v25 }
 0x31a   :  { %1543 = vmatprep.subr.bf16.mxu1 %v1715_v0 }
 0x3cf   :  { %v420_v42 = vpop.f32.mrb[2].mxu1 }
 0x3d0   :  { %v424_v43 = vadd.f32 %v420_v42, %v337_v41  ;;  %v1199_v44 = vpop.f32.mrb[3].mxu1 }
 0x3d2   :  { %1606 = vtanh.f32 %v424_v43 }
 0x3dc   :  { %v1607_v45 = vpop.eup %1606 }
 0x3dd   :  { %1233 = vmatmul.mubr.f32.vlgmr.msra.gmra.mrb[4].mxu0 %v1607_v45 }
 0x3de   :  { %1521 = vmatpush3.bf16.msra.mxu0 %v1802_v5  ;;  %1302 = vmatprep.mubr.msk.f32.mxu0 %vm1716_vm0, %v1717_v1 }
 0x3df   :  { %1522 = vmatprep.subr.bf16.mxu0 %v1715_v0 }
 0x3e2   :  { %1524 = vmatpush3.bf16.msra.mxu0 %v1805_v7 }
 0x3e3   :  { %1525 = vmatprep.subr.bf16.mxu0 %v1715_v0 }
 0x3e6   :  { %1527 = vmatpush3.bf16.msra.mxu0 %v1811_v10 }
 0x3e7   :  { %1528 = vmatprep.subr.bf16.mxu0 %v1715_v0 }
 0x3ea   :  { %1530 = vmatpush3.bf16.msra.mxu0 %v1817_v13 }
 0x3eb   :  { %1531 = vmatprep.subr.bf16.mxu0 %v1715_v0 }
 0x3ee   :  { %1533 = vmatpush3.bf16.msra.mxu0 %v1823_v16 }
 0x3ef   :  { %1534 = vmatprep.subr.bf16.mxu0 %v1715_v0 }
 0x3f2   :  { %1536 = vmatpush3.bf16.msra.mxu0 %v1829_v19 }
 0x3f3   :  { %1537 = vmatprep.subr.bf16.mxu0 %v1715_v0 }
 0x3f6   :  { %1539 = vmatpush3.bf16.msra.mxu0 %v1835_v22 }
 0x3f7   :  { %1540 = vmatprep.subr.bf16.mxu0 %v1715_v0 }
 0x3fa   :  { %1542 = vmatpush3.bf16.msra.mxu0 %v1841_v25 }
 0x3fb   :  { %1567 = vmatprep.subr.bf16.mxu0 %v1715_v0 }
 0x4b0   :  { %v512_v47 = vpop.f32.mrb[4].mxu0 }
 0x4b1   :  { %v516_v48 = vadd.f32 %v512_v47, %v429_v46  ;;  %v1234_v49 = vpop.f32.mrb[5].mxu0 }
 0x4b3   :  { %1608 = vtanh.f32 %v516_v48 }
 0x4bd   :  { %v1609_v50 = vpop.eup %1608 }
 0x4be   :  { %1268 = vmatmul.mubr.f32.vlgmr.msra.gmra.mrb[4].mxu1 %v1609_v50 }
 0x4bf   :  { %1545 = vmatpush3.bf16.msra.mxu1 %v1802_v5  ;;  %1337 = vmatprep.mubr.msk.f32.mxu1 %vm1716_vm0, %v1717_v1  ;;  %v1577_v5 = vpack.c.bf16 %v803_v4, %v802_v3 }
 0x4c0   :  { %1546 = vmatprep.subr.bf16.mxu1 %v1715_v0 }
 0x4c3   :  { %1548 = vmatpush3.bf16.msra.mxu1 %v1805_v7 }
 0x4c4   :  { %1549 = vmatprep.subr.bf16.mxu1 %v1715_v0 }
 0x4c7   :  { %1551 = vmatpush3.bf16.msra.mxu1 %v1811_v10 }
 0x4c8   :  { %1552 = vmatprep.subr.bf16.mxu1 %v1715_v0 }
 0x4cb   :  { %1554 = vmatpush3.bf16.msra.mxu1 %v1817_v13  ;;  %v806_v13 = vld [vmem:[#allocation8 + $0x50] sm:$0xff] }
 0x4cc   :  { %1555 = vmatprep.subr.bf16.mxu1 %v1715_v0  ;;  %v1583_v15 = vpack.c.bf16 %v807_v14, %v806_v13 }
 0x4cf   :  { %1557 = vmatpush3.bf16.msra.mxu1 %v1823_v16  ;;  %v808_v16 = vld [vmem:[#allocation8 + $0x60] sm:$0xff] }
 0x4d0   :  { %1558 = vmatprep.subr.bf16.mxu1 %v1715_v0  ;;  %v1586_v18 = vpack.c.bf16 %v809_v17, %v808_v16 }
 0x4d3   :  { %1560 = vmatpush3.bf16.msra.mxu1 %v1829_v19  ;;  %v810_v19 = vld [vmem:[#allocation8 + $0x70] sm:$0xff] }
 0x4d4   :  { %1561 = vmatprep.subr.bf16.mxu1 %v1715_v0  ;;  %v1589_v21 = vpack.c.bf16 %v811_v20, %v810_v19 }
 0x4d7   :  { %1563 = vmatpush3.bf16.msra.mxu1 %v1835_v22  ;;  %v705_v22 = vld [vmem:[#allocation3 + $0x38] sm:$0xff] }
 0x4d8   :  { %1564 = vmatprep.subr.bf16.mxu1 %v1715_v0 }
 0x4db   :  { %1566 = vmatpush3.bf16.msra.mxu1 %v1841_v25 }
 0x591   :  { %v604_v52 = vpop.f32.mrb[4].mxu1 }
 0x592   :  { %v608_v53 = vadd.f32 %v604_v52, %v521_v51  ;;  %v1269_v54 = vpop.f32.mrb[5].mxu1 }
 0x594   :  { %1610 = vtanh.f32 %v608_v53 }
 0x59e   :  { %v1611_v55 = vpop.eup %1610 }
 0x59f   :  { %1303 = vmatmul.mubr.f32.vlgmr.msra.gmra.mrb[6].mxu0 %v1611_v55 }
 0x5a0   :  { %1372 = vmatprep.mubr.msk.f32.mxu0 %vm1716_vm0, %v1717_v1  ;;  %1569 = vmatpush3.bf16.msra.mxu0 %v1568_v59  ;;  %v804_v1 = vld [vmem:[#allocation8 + $0x40] sm:$0xff] }
 0x5a1   :  { %1570 = vmatprep.subr.bf16.mxu0 %v1715_v0  ;;  %v1580_v7 = vpack.c.bf16 %v805_v6, %v804_v1 }
 0x5a4   :  { %1572 = vmatpush3.bf16.msra.mxu0 %v1571_v61 }
 0x5a5   :  { %1573 = vmatprep.subr.bf16.mxu0 %v1715_v0 }
 0x5a8   :  { %1575 = vmatpush3.bf16.msra.mxu0 %v1574_v2 }
 0x5a9   :  { %1576 = vmatprep.subr.bf16.mxu0 %v1715_v0 }
 0x5ac   :  { %1578 = vmatpush3.bf16.msra.mxu0 %v1577_v5 }
 0x5ad   :  { %1579 = vmatprep.subr.bf16.mxu0 %v1715_v0 }
 0x5b0   :  { %1581 = vmatpush3.bf16.msra.mxu0 %v1580_v7 }
 0x5b1   :  { %1582 = vmatprep.subr.bf16.mxu0 %v1715_v0 }
 0x5b4   :  { %1584 = vmatpush3.bf16.msra.mxu0 %v1583_v15 }
 0x5b5   :  { %1585 = vmatprep.subr.bf16.mxu0 %v1715_v0 }
 0x5b8   :  { %1587 = vmatpush3.bf16.msra.mxu0 %v1586_v18 }
 0x5b9   :  { %1588 = vmatprep.subr.bf16.mxu0 %v1715_v0 }
 0x5bc   :  { %1590 = vmatpush3.bf16.msra.mxu0 %v1589_v21 }
 0x672   :  { %v696_v9 = vpop.f32.mrb[6].mxu0 }
 0x673   :  { %v700_v10 = vadd.f32 %v696_v9, %v613_v8  ;;  %v1304_v11 = vpop.f32.mrb[7].mxu0 }
 0x675   :  { %1612 = vtanh.f32 %v700_v10 }
 0x67f   :  { %v1613_v12 = vpop.eup %1612 }
 0x680   :  { %1338 = vmatmul.mubr.f32.vlgmr.msra.gmra.mrb[6].mxu1 %v1613_v12 }
 0x753   :  { %v788_v23 = vpop.f32.mrb[6].mxu1 }
 0x754   :  { %v792_v24 = vadd.f32 %v788_v23, %v705_v22  ;;  %v1339_v25 = vpop.f32.mrb[7].mxu1 }
 0x756   :  { %1614 = vtanh.f32 %v792_v24 }
 0x760   :  { %v1615_v26 = vpop.eup %1614 }
 0x761   :  { %1373 = vmatmul.mubr.f32.vlgmr.msra.gmra.mrb[8].mxu0 %v1615_v26 }
 0x834   :  { %v885_v28 = vpop.f32.mrb[8].mxu0 }
 0x835   :  { %v886_v29 = vadd.f32 %v906_v27, %v885_v28  ;;  %v1374_v30 = vpop.f32.mrb[9].mxu0 }
 0x837   :  { %889 = vst [vmem:[#allocation9] sm:$0xff] %v886_v29 }
 0x838   :  { %1693 = shalt.err (!%p1690_p0)
}
 0x839   :  { %s1694_s5 = scalar_lea.hbm %s1986_s4, 128 }
 0x83a   :  { %p1695_p1 = scmp.ne.s32.totalorder %s1986_s4, %s1694_s5  ;;  %p1698_p2 = scmp.lt.u32.totalorder %s1694_s5, %s1986_s4 }
 0x83c   :  { %p1700_p3 = pnand %p1698_p2, %p1695_p1 }
 0x83e   :  { %1703 = shalt.err (!%p1700_p3)
}
 0x83f   :  { %899 = dma.vmem_to_hbm [thread:$0]  %s897_s27, 128, %s1986_s4, [#allocation5]  }
 0x840   :  { %1708 = dma.done.wait [#allocation5], 128  }
 0x841   :  { %1709 = vsyncadd [#allocation5], 4294967168 }
 0x842   :  { %903 = vsyncpa [#allocation4], 1 }
 0x843   :  { %904 = vsyncpa [#allocation7], 1 }
 0x844   :  { %905 = vsyncpa [#allocation5], 1 }

</bundles_post_ra>
